<compile_context>
chip_gen: v5e
topology: v5e:2x2
jax: 0.10.0
libtpu: 0.0.40
codegen_flags: <defaults>
</compile_context>

<pallas_src>
import functools

import jax
import jax.numpy as jnp
from jax.experimental import pallas as pl
from jax.experimental.pallas import tpu as pltpu


def _senet_kernel(x_ref, w1big_ref, b1_ref, w2t_ref, b2_ref, bexp_ref,
                  v_ref, a_ref, *, field_length, embed_dim):
    # x_ref:     (TB, F*E)  lane-dense slab of TB samples
    # w1big_ref: (F*E, T)   W1^T scattered to rows f*E, zero elsewhere
    # b1_ref:    (1, T)
    # w2t_ref:   (T, F)     transposed nn.Linear(T, F) weight
    # b2_ref:    (1, F)
    # bexp_ref:  (F, F*E)   0/1 expansion matrix: (a @ bexp)[:, j] == a[:, j//E]
    # v_ref:     (TB, F*E)
    # a_ref:     (TB, F)
    F, E = field_length, embed_dim
    x = x_ref[...].astype(jnp.float32)                      # (TB, F*E)

    # ---- Squeeze: per-field max over the E embedding lanes via a log2(E)
    # shift/max tree over the whole slab. After the tree, m[:, f*E] holds
    # max(x[:, f*E:(f+1)*E]); other lanes hold window maxes that straddle
    # field boundaries and are ignored (they multiply zero rows of w1big).
    m = x
    w = 1
    while w < E:
        s = min(w, E - w)
        m = jnp.maximum(m, jnp.roll(m, -s, axis=1))
        w += s

    # ---- Excitation MLP, row-batched over the TB resident samples.
    # The first matmul also performs the stride-E lane extraction on the MXU.
    h = jnp.dot(m, w1big_ref[...], preferred_element_type=jnp.float32)
    h = jnp.maximum(h + b1_ref[...], 0.0)                   # (TB, T)
    a = jnp.dot(h, w2t_ref[...], preferred_element_type=jnp.float32)
    a = jnp.maximum(a + b2_ref[...], 0.0)                   # (TB, F)

    a_ref[...] = a.astype(a_ref.dtype)

    # ---- Re-weight: broadcast a[:, f] across its field's E lanes with one
    # tiny matmul (MXU has huge slack here), then one dense lane-aligned store.
    a_full = jnp.dot(a, bexp_ref[...], preferred_element_type=jnp.float32)  # (TB, F*E)
    v_ref[...] = (a_full * x).astype(v_ref.dtype)


def senet_layer(x_emb, w1, b1, w2, b2, *, tb=2048):
    """x_emb: (B, F, E). w1: (T, F), b1: (T,), w2: (F, T), b2: (F,).

    Returns (V_embed (B, F, E), A_weight (B, F, 1)), matching the PyTorch module.
    """
    B, F, E = x_emb.shape
    T = w1.shape[0]
    FE = F * E

    # Batch tile: large enough to amortize the ~0.35 us/step pipeline overhead.
    if B <= tb:
        TB = B                        # single block (block dim == array dim is legal)
    else:
        TB = max(8, (tb // 8) * 8)    # sublane-aligned tile
    grid = pl.cdiv(B, TB)             # ragged last block -> masked partial writes

    x2 = x_emb.reshape(B, FE)         # contiguous -> free reshape

    # W1^T scattered to lane offsets f*E (folds the stride-E gather into matmul #1).
    w1t = jnp.transpose(w1).astype(jnp.float32)                         # (F, T)
    w1big = jnp.zeros((FE, T), jnp.float32).at[jnp.arange(F) * E].set(w1t)
    w2t = jnp.transpose(w2).astype(jnp.float32)                         # (T, F)
    b1r = b1.reshape(1, T).astype(jnp.float32)
    b2r = b2.reshape(1, F).astype(jnp.float32)
    # (F, F*E) 0/1 block-expansion matrix.
    bexp = (jnp.arange(FE)[None, :] // E == jnp.arange(F)[:, None]).astype(jnp.float32)

    kernel = functools.partial(_senet_kernel, field_length=F, embed_dim=E)

    grid_spec = pltpu.PrefetchScalarGridSpec(
        num_scalar_prefetch=0,
        grid=(grid,),
        in_specs=[
            pl.BlockSpec((TB, FE), lambda i: (i, 0)),   # x slab (lane-dense)
            pl.BlockSpec((FE, T), lambda i: (0, 0)),    # scattered W1^T (whole)
            pl.BlockSpec((1, T), lambda i: (0, 0)),     # b1
            pl.BlockSpec((T, F), lambda i: (0, 0)),     # W2^T (whole)
            pl.BlockSpec((1, F), lambda i: (0, 0)),     # b2
            pl.BlockSpec((F, FE), lambda i: (0, 0)),    # expansion matrix
        ],
        out_specs=[
            pl.BlockSpec((TB, FE), lambda i: (i, 0)),   # V slab (dense, lane-aligned)
            pl.BlockSpec((TB, F), lambda i: (i, 0)),    # A (narrow; ~3% of bytes)
        ],
    )

    itemsize = jnp.dtype(x_emb.dtype).itemsize
    cost = pl.CostEstimate(
        flops=2 * B * (FE * T + T * F + F * FE) + 4 * B * FE,
        transcendentals=0,
        bytes_accessed=(2 * B * FE + B * F) * itemsize,
    )

    v2, a2 = pl.pallas_call(
        kernel,
        out_shape=(
            jax.ShapeDtypeStruct((B, FE), x_emb.dtype),
            jax.ShapeDtypeStruct((B, F), x_emb.dtype),
        ),
        grid_spec=grid_spec,
        compiler_params=pltpu.CompilerParams(
            dimension_semantics=("parallel",),
            vmem_limit_bytes=32 * 1024 * 1024,
        ),
        cost_estimate=cost,
    )(x2, w1big, b1r, w2t, b2r, bexp)

    v_embed = v2.reshape(B, F, E)
    a_weight = a2.reshape(B, F, 1)
    return v_embed, a_weight


def senet_ref(x_emb, w1, b1, w2, b2):
    """Pure-JAX reference mirroring the PyTorch forward."""
    z = jnp.max(x_emb, axis=2, keepdims=True)                  # (B, F, 1)
    zt = jnp.swapaxes(z, 1, 2)                                 # (B, 1, F)
    h = jax.nn.relu(jnp.einsum("bif,tf->bit", zt, w1) + b1)    # (B, 1, T)
    a = jax.nn.relu(jnp.einsum("bit,ft->bif", h, w2) + b2)     # (B, 1, F)
    a_w = jnp.swapaxes(a, 1, 2)                                # (B, F, 1)
    return a_w * x_emb, a_w


def _run_case(key, B, F, E, ratio, tb):
    T = max(1, F // ratio)
    kx, k1, k2, k3, k4 = jax.random.split(key, 5)
    x_emb = jax.random.normal(kx, (B, F, E), dtype=jnp.float32)
    w1 = jax.random.normal(k1, (T, F), dtype=jnp.float32) * 0.1
    b1 = jax.random.normal(k2, (T,), dtype=jnp.float32) * 0.1
    w2 = jax.random.normal(k3, (F, T), dtype=jnp.float32) * 0.1
    b2 = jax.random.normal(k4, (F,), dtype=jnp.float32) * 0.1

    v_embed, a_weight = senet_layer(x_emb, w1, b1, w2, b2, tb=tb)
    jax.block_until_ready((v_embed, a_weight))

    v_ref, a_ref = senet_ref(x_emb, w1, b1, w2, b2)
    assert v_embed.shape == (B, F, E) and a_weight.shape == (B, F, 1)
    assert jnp.allclose(v_embed, v_ref, atol=1e-5, rtol=1e-5)
    assert jnp.allclose(a_weight, a_ref, atol=1e-5, rtol=1e-5)


if __name__ == "__main__":
    key = jax.random.PRNGKey(0)
    k0, k1, k2 = jax.random.split(key, 3)

    # Small shape consistent with the module: B=2, field_length F=8, embed E=32.
    _run_case(k0, B=2, F=8, E=32, ratio=1, tb=2048)

    # Multi-step grid with a ragged last block (B % TB != 0, no wrapper padding).
    _run_case(k1, B=20, F=8, E=32, ratio=2, tb=8)

    # Single block whose batch (sublane) count is not a multiple of 8.
    _run_case(k2, B=10, F=8, E=32, ratio=4, tb=2048)

    print("KERNEL_OK")
</pallas_src>

<mosaic_0001>
module attributes {stable_mosaic.version = 11 : i64} {
  func.func @_senet_kernel(%arg0: i32, %arg1: memref<2x256xf32, #tpu.memory_space<vmem>>, %arg2: memref<256x8xf32, #tpu.memory_space<vmem>>, %arg3: memref<1x8xf32, #tpu.memory_space<vmem>>, %arg4: memref<8x8xf32, #tpu.memory_space<vmem>>, %arg5: memref<1x8xf32, #tpu.memory_space<vmem>>, %arg6: memref<8x256xf32, #tpu.memory_space<vmem>>, %arg7: memref<2x256xf32, #tpu.memory_space<vmem>>, %arg8: memref<2x8xf32, #tpu.memory_space<vmem>>) attributes {dimension_semantics = [#tpu.dimension_semantics<parallel>], iteration_bounds = array<i64: 1>, scalar_prefetch = 0 : i64, scratch_operands = 0 : i64, tpu.core_type = #tpu.core_type<tc>, window_params = [{transform_indices = @transform_0, window_bounds = array<i64: 2, 256>}, {pipeline_mode = #tpu.pipeline_mode<synchronous>, transform_indices = @transform_1, window_bounds = array<i64: 256, 8>}, {pipeline_mode = #tpu.pipeline_mode<synchronous>, transform_indices = @transform_2, window_bounds = array<i64: 1, 8>}, {pipeline_mode = #tpu.pipeline_mode<synchronous>, transform_indices = @transform_3, window_bounds = array<i64: 8, 8>}, {pipeline_mode = #tpu.pipeline_mode<synchronous>, transform_indices = @transform_4, window_bounds = array<i64: 1, 8>}, {pipeline_mode = #tpu.pipeline_mode<synchronous>, transform_indices = @transform_5, window_bounds = array<i64: 8, 256>}, {transform_indices = @transform_6, window_bounds = array<i64: 2, 256>}, {transform_indices = @transform_7, window_bounds = array<i64: 2, 8>}]} {
    %c0 = arith.constant 0 : index
    %c0_0 = arith.constant 0 : index
    %0 = vector.load %arg1[%c0, %c0_0] : memref<2x256xf32, #tpu.memory_space<vmem>>, vector<2x256xf32>
    %1 = vector.extract_strided_slice %0 {offsets = [0, 1], sizes = [2, 255], strides = [1, 1]} : vector<2x256xf32> to vector<2x255xf32>
    %2 = vector.extract_strided_slice %0 {offsets = [0, 0], sizes = [2, 1], strides = [1, 1]} : vector<2x256xf32> to vector<2x1xf32>
    %3 = tpu.concatenate %1, %2 in 1 : vector<2x255xf32>, vector<2x1xf32> -> vector<2x256xf32>
    %4 = arith.maximumf %0, %3 : vector<2x256xf32>
    %5 = vector.extract_strided_slice %4 {offsets = [0, 2], sizes = [2, 254], strides = [1, 1]} : vector<2x256xf32> to vector<2x254xf32>
    %6 = vector.extract_strided_slice %4 {offsets = [0, 0], sizes = [2, 2], strides = [1, 1]} : vector<2x256xf32> to vector<2x2xf32>
    %7 = tpu.concatenate %5, %6 in 1 : vector<2x254xf32>, vector<2x2xf32> -> vector<2x256xf32>
    %8 = arith.maximumf %4, %7 : vector<2x256xf32>
    %9 = vector.extract_strided_slice %8 {offsets = [0, 4], sizes = [2, 252], strides = [1, 1]} : vector<2x256xf32> to vector<2x252xf32>
    %10 = vector.extract_strided_slice %8 {offsets = [0, 0], sizes = [2, 4], strides = [1, 1]} : vector<2x256xf32> to vector<2x4xf32>
    %11 = tpu.concatenate %9, %10 in 1 : vector<2x252xf32>, vector<2x4xf32> -> vector<2x256xf32>
    %12 = arith.maximumf %8, %11 : vector<2x256xf32>
    %13 = vector.extract_strided_slice %12 {offsets = [0, 8], sizes = [2, 248], strides = [1, 1]} : vector<2x256xf32> to vector<2x248xf32>
    %14 = vector.extract_strided_slice %12 {offsets = [0, 0], sizes = [2, 8], strides = [1, 1]} : vector<2x256xf32> to vector<2x8xf32>
    %15 = tpu.concatenate %13, %14 in 1 : vector<2x248xf32>, vector<2x8xf32> -> vector<2x256xf32>
    %16 = arith.maximumf %12, %15 : vector<2x256xf32>
    %17 = vector.extract_strided_slice %16 {offsets = [0, 16], sizes = [2, 240], strides = [1, 1]} : vector<2x256xf32> to vector<2x240xf32>
    %18 = vector.extract_strided_slice %16 {offsets = [0, 0], sizes = [2, 16], strides = [1, 1]} : vector<2x256xf32> to vector<2x16xf32>
    %19 = tpu.concatenate %17, %18 in 1 : vector<2x240xf32>, vector<2x16xf32> -> vector<2x256xf32>
    %20 = arith.maximumf %16, %19 : vector<2x256xf32>
    %c0_1 = arith.constant 0 : index
    %c0_2 = arith.constant 0 : index
    %21 = vector.load %arg2[%c0_1, %c0_2] : memref<256x8xf32, #tpu.memory_space<vmem>>, vector<256x8xf32>
    %cst = arith.constant dense<0.000000e+00> : vector<2x8xf32>
    %22 = tpu.matmul %20, %21, %cst {dimension_numbers = #tpu.dot_dimension_numbers<[1], [0], [0], [1], [0, 0, 1, 1], [], []>} : vector<2x256xf32>, vector<256x8xf32>, vector<2x8xf32> -> vector<2x8xf32>
    %c0_3 = arith.constant 0 : index
    %c0_4 = arith.constant 0 : index
    %23 = vector.load %arg3[%c0_3, %c0_4] : memref<1x8xf32, #tpu.memory_space<vmem>>, vector<1x8xf32>
    %24 = vector.broadcast %23 : vector<1x8xf32> to vector<2x8xf32>
    %25 = arith.addf %22, %24 : vector<2x8xf32>
    %cst_5 = arith.constant 0.000000e+00 : f32
    %26 = vector.broadcast %cst_5 : f32 to vector<2x8xf32>
    %27 = arith.maximumf %25, %26 : vector<2x8xf32>
    %c0_6 = arith.constant 0 : index
    %c0_7 = arith.constant 0 : index
    %28 = vector.load %arg4[%c0_6, %c0_7] : memref<8x8xf32, #tpu.memory_space<vmem>>, vector<8x8xf32>
    %cst_8 = arith.constant dense<0.000000e+00> : vector<2x8xf32>
    %29 = tpu.matmul %27, %28, %cst_8 {dimension_numbers = #tpu.dot_dimension_numbers<[1], [0], [0], [1], [0, 0, 1, 1], [], []>} : vector<2x8xf32>, vector<8x8xf32>, vector<2x8xf32> -> vector<2x8xf32>
    %c0_9 = arith.constant 0 : index
    %c0_10 = arith.constant 0 : index
    %30 = vector.load %arg5[%c0_9, %c0_10] : memref<1x8xf32, #tpu.memory_space<vmem>>, vector<1x8xf32>
    %31 = vector.broadcast %30 : vector<1x8xf32> to vector<2x8xf32>
    %32 = arith.addf %29, %31 : vector<2x8xf32>
    %cst_11 = arith.constant 0.000000e+00 : f32
    %33 = vector.broadcast %cst_11 : f32 to vector<2x8xf32>
    %34 = arith.maximumf %32, %33 : vector<2x8xf32>
    %c0_12 = arith.constant 0 : index
    %c0_13 = arith.constant 0 : index
    %35 = vector.load %arg8[%c0_12, %c0_13] : memref<2x8xf32, #tpu.memory_space<vmem>>, vector<2x8xf32>
    tpu.vector_store %arg8[%c0_12, %c0_13], %34 {strides = array<i32>} : memref<2x8xf32, #tpu.memory_space<vmem>>, vector<2x8xf32>,
    %c0_14 = arith.constant 0 : index
    %c0_15 = arith.constant 0 : index
    %36 = vector.load %arg6[%c0_14, %c0_15] : memref<8x256xf32, #tpu.memory_space<vmem>>, vector<8x256xf32>
    %cst_16 = arith.constant dense<0.000000e+00> : vector<2x256xf32>
    %37 = tpu.matmul %34, %36, %cst_16 {dimension_numbers = #tpu.dot_dimension_numbers<[1], [0], [0], [1], [0, 0, 1, 1], [], []>} : vector<2x8xf32>, vector<8x256xf32>, vector<2x256xf32> -> vector<2x256xf32>
    %38 = arith.mulf %37, %0 : vector<2x256xf32>
    %c0_17 = arith.constant 0 : index
    %c0_18 = arith.constant 0 : index
    %39 = vector.load %arg7[%c0_17, %c0_18] : memref<2x256xf32, #tpu.memory_space<vmem>>, vector<2x256xf32>
    tpu.vector_store %arg7[%c0_17, %c0_18], %38 {strides = array<i32>} : memref<2x256xf32, #tpu.memory_space<vmem>>, vector<2x256xf32>,
    return
  }
  func.func @transform_0(%arg0: i32) -> (i32, i32) {
    %c0_i32 = arith.constant 0 : i32
    %c0_i32_0 = arith.constant 0 : i32
    return %arg0, %c0_i32 : i32, i32
  }
  func.func @transform_1(%arg0: i32) -> (i32, i32) {
    %c0_i32 = arith.constant 0 : i32
    %c0_i32_0 = arith.constant 0 : i32
    %c0_i32_1 = arith.constant 0 : i32
    return %c0_i32, %c0_i32_0 : i32, i32
  }
  func.func @transform_2(%arg0: i32) -> (i32, i32) {
    %c0_i32 = arith.constant 0 : i32
    %c0_i32_0 = arith.constant 0 : i32
    %c0_i32_1 = arith.constant 0 : i32
    return %c0_i32, %c0_i32_0 : i32, i32
  }
  func.func @transform_3(%arg0: i32) -> (i32, i32) {
    %c0_i32 = arith.constant 0 : i32
    %c0_i32_0 = arith.constant 0 : i32
    %c0_i32_1 = arith.constant 0 : i32
    return %c0_i32, %c0_i32_0 : i32, i32
  }
  func.func @transform_4(%arg0: i32) -> (i32, i32) {
    %c0_i32 = arith.constant 0 : i32
    %c0_i32_0 = arith.constant 0 : i32
    %c0_i32_1 = arith.constant 0 : i32
    return %c0_i32, %c0_i32_0 : i32, i32
  }
  func.func @transform_5(%arg0: i32) -> (i32, i32) {
    %c0_i32 = arith.constant 0 : i32
    %c0_i32_0 = arith.constant 0 : i32
    %c0_i32_1 = arith.constant 0 : i32
    return %c0_i32, %c0_i32_0 : i32, i32
  }
  func.func @transform_6(%arg0: i32) -> (i32, i32) {
    %c0_i32 = arith.constant 0 : i32
    %c0_i32_0 = arith.constant 0 : i32
    return %arg0, %c0_i32 : i32, i32
  }
  func.func @transform_7(%arg0: i32) -> (i32, i32) {
    %c0_i32 = arith.constant 0 : i32
    %c0_i32_0 = arith.constant 0 : i32
    return %arg0, %c0_i32 : i32, i32
  }
}

</mosaic_0001>

<bundles_post_ra>
// kernel: tpu_custom_call.1
= control target key start
LH: loop header
LB: loop body
LE: loop exit
PB: predicated region body
PF: predicated region fallthrough
CT: control target
= control target key end

     0   :  { %13 = vsyncpa [#allocation3], 0  ;;  %s592_s0 = inlined_call_operand.vmem [shape: f32[2,256], index: 0, kind: input, shape index: {}]   ;;  %s593_s1 = inlined_call_operand.vmem [shape: f32[256,8], index: 1, kind: input, shape index: {}]   ;;  %s594_s2 = inlined_call_operand.vmem [shape: f32[1,8], index: 2, kind: input, shape index: {}]   ;;  %s595_s3 = inlined_call_operand.vmem [shape: f32[8,8], index: 3, kind: input, shape index: {}]   ;;  %s596_s4 = inlined_call_operand.vmem [shape: f32[1,8], index: 4, kind: input, shape index: {}]   ;;  %s597_s5 = inlined_call_operand.vmem [shape: f32[8,256], index: 5, kind: input, shape index: {}]   ;;  %s598_s6 = inlined_call_operand.hbm [shape: f32[2,256], index: 6, kind: output, shape index: {0}]   ;;  %s599_s7 = inlined_call_operand.hbm [shape: f32[2,8], index: 7, kind: output, shape index: {1}]  }
   0x1   :  { %v458_v0 = vld [vmem:[%s592_s0] sm:$0xf] }
   0x2   :  { %29 = vst [vmem:[#allocation1] ss:$4 sm:$0xff] %v458_v0 }
   0x3   :  { %14 = vsyncpa [#allocation5], 0  ;;  %s408_s26 = smov 127   ;;  %vm36_vm0 = vcmask 1039360   ;;  %vm47_vm1 = vcmask 1041408   ;;  %s409_s0 = smov 126  }
   0x4   :  { %vm59_vm2 = vcmask 1031168   ;;  %s410_s27 = smov 124   ;;  %vm81_vm3 = vcmask 1014784   ;;  %s411_s28 = smov 120   ;;  %vm103_vm4 = vcmask 982016   ;;  %v154_v48 = vld [vmem:[%s593_s1 + $0x78] sm:$0xff] }
   0x5   :  { %s412_s29 = smov 112   ;;  %v170_v49 = vld [vmem:[%s593_s1 + $0xf8] sm:$0xff]  ;;  %v153_v50 = vld [vmem:[%s593_s1 + $0x70] sm:$0xff]  ;;  %181 = vmatpush.msra.mxu0 %v154_v48  ;;  %v152_v52 = vld [vmem:[%s593_s1 + $0x68] sm:$0xff]  ;;  %vm125_vm5 = vcmask 916480   ;;  %vm227_vm6 = vcmask 64512  }
   0x6   :  { %201 = vmatpush.msra.mxu1 %v170_v49  ;;  %v169_v51 = vld [vmem:[%s593_s1 + $0xf0] sm:$0xff]  ;;  %v168_v53 = vld [vmem:[%s593_s1 + $0xe8] sm:$0xff]  ;;  %v151_v54 = vld [vmem:[%s593_s1 + $0x60] sm:$0xff]  ;;  %vm252_vm7 = vcmask 58368   ;;  %s330_s10 = sshll.u32 %s599_s7, 4  ;;  %s319_s13 = sshll.u32 %s598_s6, 4  ;;  %s331_s10 = int_to_ptr.hbm [resolvable:$true] %s330_s10  ;;  %s320_s13 = int_to_ptr.hbm [resolvable:$true] %s319_s13 }
   0x7   :  { %182 = vmatpush.msra.mxu0 %v153_v50  ;;  %v167_v55 = vld [vmem:[%s593_s1 + $0xe0] sm:$0xff]  ;;  %v150_v56 = vld [vmem:[%s593_s1 + $0x58] sm:$0xff]  ;;  %v149_v58 = vld [vmem:[%s593_s1 + $0x50] sm:$0xff] }
   0x8   :  { %202 = vmatpush.msra.mxu1 %v169_v51  ;;  %v166_v57 = vld [vmem:[%s593_s1 + $0xd8] sm:$0xff]  ;;  %v165_v59 = vld [vmem:[%s593_s1 + $0xd0] sm:$0xff]  ;;  %v148_v60 = vld [vmem:[%s593_s1 + $0x48] sm:$0xff] }
   0x9   :  { %v31_v1 = vld.sshfl [vmem:[#allocation1 + $0x8] sm:$0xff pattern:$0x73625140]  ;;  %v30_v2 = vld.sshfl [vmem:[#allocation1] sm:$0xff pattern:$0x73625140]  ;;  %183 = vmatpush.msra.mxu0 %v152_v52 }
   0xa   :  { %34 = vrot.lane.b32.xlu0 %v31_v1, %s408_s26  ;;  %32 = vrot.lane.b32.xlu1 %v30_v2, %s408_s26  ;;  %39 = vst [vmem:[#allocation1] ss:$4 sm:$0xff] %v458_v0  ;;  %v164_v61 = vld [vmem:[%s593_s1 + $0xc8] sm:$0xff]  ;;  %v147_v62 = vld [vmem:[%s593_s1 + $0x40] sm:$0xff] }
   0xb   :  { %203 = vmatpush.msra.mxu1 %v168_v53  ;;  %184 = vmatpush.msra.mxu0 %v151_v54  ;;  %v163_v63 = vld [vmem:[%s593_s1 + $0xc0] sm:$0xff]  ;;  %v146_v1 = vld [vmem:[%s593_s1 + $0x38] sm:$0xff] }
   0xc   :  { %v162_v2 = vld [vmem:[%s593_s1 + $0xb8] sm:$0xff] }
   0xd   :  { %204 = vmatpush.msra.mxu1 %v167_v55  ;;  %185 = vmatpush.msra.mxu0 %v150_v56 }
   0xf   :  { %205 = vmatpush.msra.mxu1 %v166_v57  ;;  %186 = vmatpush.msra.mxu0 %v149_v58 }
  0x11   :  { %v40_v3 = vld.sshfl [vmem:[#allocation1] sm:$0xff pattern:$0x73625140]  ;;  %206 = vmatpush.msra.mxu1 %v165_v59  ;;  %187 = vmatpush.msra.mxu0 %v148_v60 }
  0x12   :  { %41 = vrot.lane.b32.xlu0 %v40_v3, %s408_s26  ;;  %v145_v3 = vld [vmem:[%s593_s1 + $0x30] sm:$0xff] }
  0x13   :  { %207 = vmatpush.msra.mxu1 %v164_v61  ;;  %188 = vmatpush.msra.mxu0 %v147_v62 }
  0x15   :  { %208 = vmatpush.msra.mxu1 %v163_v63  ;;  %189 = vmatpush.msra.mxu0 %v146_v1 }
  0x17   :  { %209 = vmatpush.msra.mxu1 %v162_v2  ;;  %190 = vmatpush.msra.mxu0 %v145_v3 }
  0x7c   :  { %v35_v4 = vpop.permute.xlu0 %34  ;;  %v33_v5 = vpop.permute.xlu1 %32 }
  0x7d   :  { %v37_v9 = vsel %vm36_vm0, %v33_v5, %v35_v4  ;;  %v144_v5 = vld [vmem:[%s593_s1 + $0x28] sm:$0xff] }
  0x7e   :  { %191 = vmatpush.msra.mxu0 %v144_v5 }
  0x84   :  { %v42_v6 = vpop.permute.xlu0 %41 }
  0x85   :  { %v44_v7 = vsel %vm36_vm0, %v35_v4, %v42_v6  ;;  %v161_v4 = vld [vmem:[%s593_s1 + $0xb0] sm:$0xff]  ;;  %v160_v6 = vld [vmem:[%s593_s1 + $0xa8] sm:$0xff] }
  0x86   :  { %v46_v8 = vrot.slane %v44_v7, 6  ;;  %210 = vmatpush.msra.mxu1 %v161_v4  ;;  %v143_v7 = vld [vmem:[%s593_s1 + $0x20] sm:$0xff] }
  0x87   :  { %192 = vmatpush.msra.mxu0 %v143_v7 }
  0x88   :  { %v48_v10 = vsel %vm47_vm1, %v37_v9, %v46_v8  ;;  %211 = vmatpush.msra.mxu1 %v160_v6  ;;  %v159_v8 = vld [vmem:[%s593_s1 + $0xa0] sm:$0xff]  ;;  %v142_v9 = vld [vmem:[%s593_s1 + $0x18] sm:$0xff] }
  0x89   :  { %v50_v11 = vmax.f32 %v458_v0, %v48_v10  ;;  %v158_v10 = vld [vmem:[%s593_s1 + $0x98] sm:$0xff]  ;;  %193 = vmatpush.msra.mxu0 %v142_v9 }
  0x8a   :  { %212 = vmatpush.msra.mxu1 %v159_v8 }
  0x8b   :  { %52 = vst [vmem:[#allocation1] ss:$4 sm:$0xff] %v50_v11 }
  0x8c   :  { %213 = vmatpush.msra.mxu1 %v158_v10 }
  0x92   :  { %v53_v12 = vld.sshfl [vmem:[#allocation1] sm:$0xff pattern:$0x73625140]  ;;  %v54_v13 = vld.sshfl [vmem:[#allocation1 + $0x8] sm:$0xff pattern:$0x73625140] }
  0x93   :  { %57 = vrot.lane.b32.xlu1 %v54_v13, %s409_s0  ;;  %62 = vst [vmem:[#allocation1] ss:$4 sm:$0xff] %v50_v11  ;;  %v140_v13 = vld [vmem:[%s593_s1 + $0x8] sm:$0xff] }
  0x9a   :  { %v63_v14 = vld.sshfl [vmem:[#allocation1] sm:$0xff pattern:$0x73625140] }
  0x9b   :  { %64 = vrot.lane.b32.xlu2 %v63_v14, %s409_s0  ;;  %v156_v14 = vld [vmem:[%s593_s1 + $0x88] sm:$0xff] }
  0xa3   :  { %55 = vrot.lane.b32.xlu2 %v53_v12, %s409_s0  ;;  %v157_v12 = vld [vmem:[%s593_s1 + $0x90] sm:$0xff] }
  0xa4   :  { %214 = vmatpush.msra.mxu1 %v157_v12 }
  0xa6   :  { %215 = vmatpush.msra.mxu1 %v156_v14 }
  0xf5   :  { %v65_v15 = vpop.permute.xlu2 %64 }
  0xfd   :  { %v56_v18 = vpop.permute.xlu2 %55 }
 0x105   :  { %v58_v16 = vpop.permute.xlu1 %57 }
 0x106   :  { %v67_v17 = vsel %vm59_vm2, %v58_v16, %v65_v15  ;;  %v60_v20 = vsel %vm59_vm2, %v56_v18, %v58_v16  ;;  %v139_v15 = vld [vmem:[%s593_s1] sm:$0xff] }
 0x107   :  { %v69_v19 = vrot.slane %v67_v17, 6  ;;  %v155_v16 = vld [vmem:[%s593_s1 + $0x80] sm:$0xff] }
 0x108   :  { %216 = vmatpush.msra.mxu1 %v155_v16 }
 0x109   :  { %v70_v21 = vsel %vm47_vm1, %v60_v20, %v69_v19 }
 0x10a   :  { %v72_v22 = vmax.f32 %v50_v11, %v70_v21  ;;  %v141_v11 = vld [vmem:[%s593_s1 + $0x10] sm:$0xff] }
 0x10b   :  { %194 = vmatpush.msra.mxu0 %v141_v11 }
 0x10c   :  { %74 = vst [vmem:[#allocation1] ss:$4 sm:$0xff] %v72_v22 }
 0x10d   :  { %195 = vmatpush.msra.mxu0 %v140_v13 }
 0x10f   :  { %196 = vmatpush.msra.mxu0 %v139_v15 }
 0x113   :  { %v76_v23 = vld.sshfl [vmem:[#allocation1 + $0x8] sm:$0xff pattern:$0x73625140]  ;;  %v75_v24 = vld.sshfl [vmem:[#allocation1] sm:$0xff pattern:$0x73625140] }
 0x114   :  { %79 = vrot.lane.b32.xlu0 %v76_v23, %s410_s27  ;;  %77 = vrot.lane.b32.xlu2 %v75_v24, %s410_s27  ;;  %84 = vst [vmem:[#allocation1] ss:$4 sm:$0xff] %v72_v22 }
 0x11b   :  { %v85_v25 = vld.sshfl [vmem:[#allocation1] sm:$0xff pattern:$0x73625140] }
 0x11c   :  { %86 = vrot.lane.b32.xlu1 %v85_v25, %s410_s27 }
 0x16e   :  { %v78_v29 = vpop.permute.xlu2 %77 }
 0x186   :  { %v80_v26 = vpop.permute.xlu0 %79 }
 0x187   :  { %v82_v31 = vsel %vm81_vm3, %v78_v29, %v80_v26  ;;  %v354_v29 = vld [vmem:[%s594_s2] ss:$0 sm:$0xff]  ;;  %s413_s2 = smov [#allocation4]  }
 0x188   :  { %s328_s30 = sshll.u32 %s413_s2, 4  ;;  %s329_s30 = int_to_ptr.vmem [resolvable:$true] %s328_s30 }
 0x18e   :  { %v87_v27 = vpop.permute.xlu1 %86 }
 0x18f   :  { %v89_v28 = vsel %vm81_vm3, %v80_v26, %v87_v27  ;;  %v222_v27 = vld [vmem:[%s595_s3] sm:$0xff] }
 0x190   :  { %v91_v30 = vrot.slane %v89_v28, 6  ;;  %246 = vmatpush.msra.mxu2 %v222_v27  ;;  %v255_v28 = vld [vmem:[%s597_s5 + $0x8] sm:$0xff] }
 0x192   :  { %v92_v32 = vsel %vm47_vm1, %v82_v31, %v91_v30  ;;  %294 = vmatpush.msrb.mxu2 %v255_v28 }
 0x193   :  { %v94_v33 = vmax.f32 %v72_v22, %v92_v32 }
 0x195   :  { %96 = vst [vmem:[#allocation1] ss:$4 sm:$0xff] %v94_v33 }
 0x19c   :  { %v98_v34 = vld.sshfl [vmem:[#allocation1 + $0x8] sm:$0xff pattern:$0x73625140]  ;;  %v97_v35 = vld.sshfl [vmem:[#allocation1] sm:$0xff pattern:$0x73625140] }
 0x19d   :  { %101 = vrot.lane.b32.xlu0 %v98_v34, %s411_s28  ;;  %99 = vrot.lane.b32.xlu2 %v97_v35, %s411_s28  ;;  %106 = vst [vmem:[#allocation1] ss:$4 sm:$0xff] %v94_v33  ;;  %v254_v34 = vld [vmem:[%s597_s5] sm:$0xff] }
 0x19e   :  { %274 = vmatpush.msra.mxu3 %v254_v34  ;;  %v355_v35 = vld [vmem:[%s596_s4] ss:$0 sm:$0xff]  ;;  %s414_s4 = smov [#allocation2]  }
 0x19f   :  { %s317_s5 = sshll.u32 %s414_s4, 4  ;;  %s318_s5 = int_to_ptr.vmem [resolvable:$true] %s317_s5 }
 0x1a4   :  { %v107_v36 = vld.sshfl [vmem:[#allocation1] sm:$0xff pattern:$0x73625140] }
 0x1a5   :  { %108 = vrot.lane.b32.xlu1 %v107_v36, %s411_s28 }
 0x1f7   :  { %v100_v40 = vpop.permute.xlu2 %99 }
 0x20f   :  { %v102_v37 = vpop.permute.xlu0 %101 }
 0x210   :  { %v104_v42 = vsel %vm103_vm4, %v100_v40, %v102_v37 }
 0x217   :  { %v109_v38 = vpop.permute.xlu1 %108 }
 0x218   :  { %v111_v39 = vsel %vm103_vm4, %v102_v37, %v109_v38 }
 0x219   :  { %v113_v41 = vrot.slane %v111_v39, 6 }
 0x21b   :  { %v114_v43 = vsel %vm47_vm1, %v104_v42, %v113_v41 }
 0x21c   :  { %v467_v44 = vmax.f32 %v94_v33, %v114_v43 }
 0x21e   :  { %118 = vst [vmem:[#allocation1] ss:$4 sm:$0xff] %v467_v44 }
 0x225   :  { %v120_v45 = vld.sshfl [vmem:[#allocation1 + $0x8] sm:$0xff pattern:$0x73625140]  ;;  %v119_v46 = vld.sshfl [vmem:[#allocation1] sm:$0xff pattern:$0x73625140] }
 0x226   :  { %123 = vrot.lane.b32.xlu0 %v120_v45, %s412_s29  ;;  %121 = vrot.lane.b32.xlu2 %v119_v46, %s412_s29  ;;  %128 = vst [vmem:[#allocation1] ss:$4 sm:$0xff] %v467_v44 }
 0x22d   :  { %v129_v47 = vld.sshfl [vmem:[#allocation1] sm:$0xff pattern:$0x73625140] }
 0x22e   :  { %130 = vrot.lane.b32.xlu1 %v129_v47, %s412_s29 }
 0x280   :  { %v122_v20 = vpop.permute.xlu2 %121 }
 0x298   :  { %v124_v17 = vpop.permute.xlu0 %123 }
 0x299   :  { %v126_v22 = vsel %vm125_vm5, %v122_v20, %v124_v17 }
 0x2a0   :  { %v131_v18 = vpop.permute.xlu1 %130 }
 0x2a1   :  { %v133_v19 = vsel %vm125_vm5, %v124_v17, %v131_v18 }
 0x2a2   :  { %v135_v21 = vrot.slane %v133_v19, 6 }
 0x2a4   :  { %v136_v23 = vsel %vm47_vm1, %v126_v22, %v135_v21 }
 0x2a5   :  { %v138_v24 = vmax.f32 %v467_v44, %v136_v23 }
 0x2a7   :  { %176 = vst [vmem:[#allocation1] ss:$4 sm:$0xff] %v138_v24 }
 0x2ae   :  { %v177_v25 = vld.sshfl [vmem:[#allocation1] sm:$0xff pattern:$0x73625140]  ;;  %v178_v26 = vld.sshfl [vmem:[#allocation1 + $0x8] sm:$0xff pattern:$0x73625140] }
 0x2af   :  { %197 = vmatmul.f32.vlgmr.msra.gmra.mxu0 %v177_v25  ;;  %217 = vmatmul.f32.vlgmr.msra.gmra.mxu1 %v178_v26  ;;  %299 = vst [vmem:[#allocation1] ss:$4 sm:$0xff] %v458_v0 }
 0x2b6   :  { %v301_v39 = vld.sshfl [vmem:[#allocation1 + $0x8] sm:$0xff pattern:$0x73625140]  ;;  %v300_v41 = vld.sshfl [vmem:[#allocation1] sm:$0xff pattern:$0x73625140] }
 0x32c   :  { %v198_v30 = vpop.f32.mrf.mxu0  ;;  %v218_v32 = vpop.f32.mrf.mxu1 }
 0x32d   :  { %v199_v31 = vadd.f32 %v354_v29, %v198_v30 }
 0x32f   :  { %v219_v33 = vadd.f32 %v218_v32, %v199_v31 }
 0x331   :  { %v221_v0 = vmax.f32 %v219_v33, 0.0 }
 0x333   :  { %344 = vmatmul.msk.f32.vlgmr.msra.gmra.mxu2 %vm227_vm6, %v221_v0 }
 0x3b6   :  { %v248_v36 = vpop.f32.mrf.mxu2 }
 0x3b7   :  { %v249_v37 = vadd.f32 %v355_v35, %v248_v36 }
 0x3b9   :  { %v251_v38 = vmax.f32 %v249_v37, 0.0 }
 0x3bb   :  { %345 = vmatmul.msk.f32.vlgmr.msra.gmra.mxu3 %vm227_vm6, %v251_v38  ;;  %346 = vmatmul.msk.f32.vlgmr.msrb.gmra.mxu2 %vm227_vm6, %v251_v38  ;;  %253 = vst.msk [vmem:[#allocation4] sm:$0x3] %vm252_vm7, %v251_v38 }
 0x3bc   :  { %333 = dma.vmem_to_hbm [thread:$0]  %s329_s30, 32, %s331_s10, [#allocation5]  }
 0x43e   :  { %v276_v40 = vpop.f32.mrf.mxu3  ;;  %v296_v42 = vpop.f32.mrf.mxu2 }
 0x43f   :  { %v305_v43 = vmul.f32 %v301_v39, %v296_v42  ;;  %v304_v44 = vmul.f32 %v300_v41, %v276_v40 }
 0x441   :  { %v308_v45 = vrot.slane %v305_v43, 6 }
 0x443   :  { %v309_v46 = vsel %vm47_vm1, %v304_v44, %v308_v45 }
 0x444   :  { %311 = vst [vmem:[#allocation2] sm:$0xf] %v309_v46 }
 0x445   :  { %322 = dma.vmem_to_hbm [thread:$0]  %s318_s5, 64, %s320_s13, [#allocation3]  }
 0x446   :  { %404 = dma.done.wait [#allocation3], 64  }
 0x447   :  { %405 = vsyncadd [#allocation3], 4294967232 }
 0x448   :  { %406 = dma.done.wait [#allocation5], 32  }
 0x449   :  { %407 = vsyncadd [#allocation5], 4294967264 }
 0x44a   :  { %342 = vsyncpa [#allocation3], 1 }
 0x44b   :  { %343 = vsyncpa [#allocation5], 1 }

</bundles_post_ra>
